<compile_context>
chip_gen: v7x
topology: tpu7x:2x2x1
jax: 0.10.0
libtpu: 0.0.40
codegen_flags: <defaults>
</compile_context>

<pallas_src>
import jax
import jax.numpy as jnp
from jax.experimental import pallas as pl
from jax.experimental.pallas import tpu as pltpu


# ----------------------------------------------------------------------------
# Fused kernel: block-diagonal 1x1 conv + ReLU + avg-pool + bf16 cast + head.
# ----------------------------------------------------------------------------
def predictor_kernel(x_ref, wblk_ref, bias_ref, pool_ref, hw_ref, hb_ref, o_ref):
    # x_ref    : (n_branches*C, N*HW) f32   stacked branch inputs
    # wblk_ref : (D, n_branches*C)    f32   block-diagonal conv weights
    # bias_ref : (D, 1)               f32   concatenated conv biases
    # pool_ref : (N*HW, N)            f32   average-pool matrix (carries 1/HW)
    # hw_ref   : (OUT, D)             bf16  PyTorch Linear weight layout
    # hb_ref   : (OUT, 1)             bf16  Linear bias (column)
    # o_ref    : (OUT, N)             bf16  output (transposed in wrapper)

    # 1x1 conv over all branches/batch: a single MXU push (f32 x f32 -> f32).
    s = jnp.dot(wblk_ref[...], x_ref[...],
                preferred_element_type=jnp.float32)           # (D, N*HW)
    # bias + ReLU on the VPU (f32; v5e has no bf16 VALU).
    s = jnp.maximum(s + bias_ref[...], 0.0)
    # Global average pool as a matmul -> features in (D, N) orientation.
    feat = jnp.dot(s, pool_ref[...],
                   preferred_element_type=jnp.float32)        # (D, N)
    # DTypeConverter(bfloat16): quantize features to bf16, then compute the
    # head with f32 operands (bf16 x bf16 dots are rejected by the CPU
    # interpret executor; on TPU this is a bf16-quantized f32 matmul).
    feat = feat.astype(jnp.bfloat16).astype(jnp.float32)
    out_t = jnp.dot(hw_ref[...].astype(jnp.float32), feat,
                    preferred_element_type=jnp.float32)       # (OUT, N)
    out_t = out_t + hb_ref[...].astype(jnp.float32)
    o_ref[...] = out_t.astype(jnp.bfloat16)


# ----------------------------------------------------------------------------
# Predictor forward: List[Tensor] -> Tensor (single fused pallas_call)
# ----------------------------------------------------------------------------
def predictor_forward(xs_nchw, branch_ws, branch_bs, head_w, head_b):
    """xs_nchw:   list of (N, C, H, W) f32 branch inputs.
    branch_ws: list of (F, C) f32 (PyTorch Conv2d 1x1 weight, squeezed).
    branch_bs: list of (F,)   f32 (PyTorch Conv2d bias).
    head_w:    (OUT, D) bf16 (PyTorch Linear weight layout).
    head_b:    (OUT,)   bf16 (PyTorch Linear bias).
    Returns (N, OUT) bf16."""
    n_branches = len(xs_nchw)
    N, C, H, W = xs_nchw[0].shape
    HW = H * W
    F = branch_ws[0].shape[0]
    OUT, D = head_w.shape
    assert D == n_branches * F

    # Stacked conv operand: (n_branches*C, N*HW).  Rows ordered (branch, c),
    # columns ordered (n, hw).  The per-branch (N,C)<->(C,N) swap moves
    # contiguous HW-length rows and is done once in the wrapper (tiny here);
    # it is what lets the whole conv be ONE block-diagonal matmul with batch
    # on the lane axis and features emerging already in (D, N) orientation.
    x_cols = [jnp.transpose(x.reshape(N, C, HW), (1, 0, 2)).reshape(C, N * HW)
              for x in xs_nchw]
    x_stk = jnp.concatenate(x_cols, axis=0)                    # (nb*C, N*HW)

    # Block-diagonal conv weight (D, n_branches*C) and concatenated bias (D,1).
    w_blk = jax.scipy.linalg.block_diag(*branch_ws).astype(jnp.float32)
    bias_col = jnp.concatenate([b.reshape(F, 1) for b in branch_bs],
                               axis=0).astype(jnp.float32)     # (D, 1)

    # Average-pool matrix (N*HW, N); the exact power-of-two 1/HW scale rides
    # inside the matmul, so the kernel has no separate scaling multiply.
    pool = (jnp.repeat(jnp.eye(N, dtype=jnp.float32), HW, axis=0)
            * jnp.float32(1.0 / HW))                           # (N*HW, N)

    head_b_col = head_b.reshape(OUT, 1)                        # (OUT, 1) bf16

    vmem = pl.BlockSpec(memory_space=pltpu.MemorySpace.VMEM)
    out_t = pl.pallas_call(
        predictor_kernel,
        out_shape=jax.ShapeDtypeStruct((OUT, N), jnp.bfloat16),
        in_specs=[vmem] * 6,
        out_specs=vmem,
    )(x_stk, w_blk, bias_col, pool, head_w, head_b_col)

    return out_t.T                                             # (N, OUT) bf16


if __name__ == "__main__":
    key = jax.random.PRNGKey(0)

    N, C, H, W = 2, 4, 16, 16
    N_BRANCHES = 3
    F = 32        # per-branch feature width
    OUT = 16      # head output dim
    D = N_BRANCHES * F

    keys = jax.random.split(key, 2 * N_BRANCHES + 2)

    # multi-branch inputs (NCHW, like the PyTorch module expects)
    xs = [jax.random.normal(keys[i], (N, C, H, W), dtype=jnp.float32)
          for i in range(N_BRANCHES)]

    # per-branch 1x1-conv parameters, native PyTorch layouts
    branch_ws = [0.1 * jax.random.normal(keys[N_BRANCHES + i], (F, C),
                                         dtype=jnp.float32)
                 for i in range(N_BRANCHES)]
    branch_bs = [0.01 * jnp.ones((F,), dtype=jnp.float32)
                 for _ in range(N_BRANCHES)]

    # bf16 head (DTypeConverter(head_dtype=bfloat16) + Linear)
    head_w = (0.05 * jax.random.normal(keys[-2], (OUT, D),
                                       dtype=jnp.float32)).astype(jnp.bfloat16)
    head_b = (0.01 * jax.random.normal(keys[-1], (OUT,),
                                       dtype=jnp.float32)).astype(jnp.bfloat16)

    fwd = jax.jit(predictor_forward)
    out = fwd(xs, branch_ws, branch_bs, head_w, head_b)
    out = jax.block_until_ready(out)
    assert out.shape == (N, OUT) and out.dtype == jnp.bfloat16

    # pure-JAX reference (f32 branch compute, bf16 feature cast, bf16 head
    # params with f32 accumulation)
    feats = []
    for x, w, b in zip(xs, branch_ws, branch_bs):
        xf = jnp.transpose(x, (0, 2, 3, 1)).reshape(N, H * W, C)   # (N, HW, C)
        s = jnp.einsum("nhc,fc->nhf", xf, w,
                       precision=jax.lax.Precision.HIGHEST)
        s = jnp.maximum(s + b[None, None, :], 0.0)
        feats.append(jnp.mean(s, axis=1))                          # (N, F)
    feat = jnp.concatenate(feats, axis=-1).astype(jnp.bfloat16)    # (N, D)
    ref = (feat.astype(jnp.float32) @ head_w.astype(jnp.float32).T
           + head_b.astype(jnp.float32)[None, :]).astype(jnp.bfloat16)

    assert jnp.allclose(out.astype(jnp.float32), ref.astype(jnp.float32),
                        atol=2e-2, rtol=2e-2)

    print("KERNEL_OK")
</pallas_src>

<mosaic_0001>
module attributes {stable_mosaic.version = 11 : i64} {
  func.func @predictor_kernel(%arg0: memref<12x512xf32, #tpu.memory_space<vmem>>, %arg1: memref<96x12xf32, #tpu.memory_space<vmem>>, %arg2: memref<96x1xf32, #tpu.memory_space<vmem>>, %arg3: memref<512x2xf32, #tpu.memory_space<vmem>>, %arg4: memref<16x96xbf16, #tpu.memory_space<vmem>>, %arg5: memref<16x1xbf16, #tpu.memory_space<vmem>>, %arg6: memref<16x2xbf16, #tpu.memory_space<vmem>>) attributes {dimension_semantics = [], scalar_prefetch = 0 : i64, scratch_operands = 0 : i64, tpu.core_type = #tpu.core_type<tc>} {
    %c0 = arith.constant 0 : index
    %c0_0 = arith.constant 0 : index
    %0 = vector.load %arg1[%c0, %c0_0] : memref<96x12xf32, #tpu.memory_space<vmem>>, vector<96x12xf32>
    %c0_1 = arith.constant 0 : index
    %c0_2 = arith.constant 0 : index
    %1 = vector.load %arg0[%c0_1, %c0_2] : memref<12x512xf32, #tpu.memory_space<vmem>>, vector<12x512xf32>
    %cst = arith.constant dense<0.000000e+00> : vector<96x512xf32>
    %2 = tpu.matmul %0, %1, %cst {dimension_numbers = #tpu.dot_dimension_numbers<[1], [0], [0], [1], [0, 0, 1, 1], [], []>} : vector<96x12xf32>, vector<12x512xf32>, vector<96x512xf32> -> vector<96x512xf32>
    %c0_3 = arith.constant 0 : index
    %c0_4 = arith.constant 0 : index
    %3 = vector.load %arg2[%c0_3, %c0_4] : memref<96x1xf32, #tpu.memory_space<vmem>>, vector<96x1xf32>
    %4 = vector.broadcast %3 : vector<96x1xf32> to vector<96x512xf32>
    %5 = arith.addf %2, %4 : vector<96x512xf32>
    %cst_5 = arith.constant 0.000000e+00 : f32
    %6 = vector.broadcast %cst_5 : f32 to vector<96x512xf32>
    %7 = arith.maximumf %5, %6 : vector<96x512xf32>
    %c0_6 = arith.constant 0 : index
    %c0_7 = arith.constant 0 : index
    %8 = vector.load %arg3[%c0_6, %c0_7] : memref<512x2xf32, #tpu.memory_space<vmem>>, vector<512x2xf32>
    %cst_8 = arith.constant dense<0.000000e+00> : vector<96x2xf32>
    %9 = tpu.matmul %7, %8, %cst_8 {dimension_numbers = #tpu.dot_dimension_numbers<[1], [0], [0], [1], [0, 0, 1, 1], [], []>} : vector<96x512xf32>, vector<512x2xf32>, vector<96x2xf32> -> vector<96x2xf32>
    %10 = arith.truncf %9 : vector<96x2xf32> to vector<96x2xbf16>
    %11 = arith.extf %10 : vector<96x2xbf16> to vector<96x2xf32>
    %c0_9 = arith.constant 0 : index
    %c0_10 = arith.constant 0 : index
    %12 = vector.load %arg4[%c0_9, %c0_10] : memref<16x96xbf16, #tpu.memory_space<vmem>>, vector<16x96xbf16>
    %13 = arith.extf %12 : vector<16x96xbf16> to vector<16x96xf32>
    %cst_11 = arith.constant dense<0.000000e+00> : vector<16x2xf32>
    %14 = tpu.matmul %13, %11, %cst_11 {dimension_numbers = #tpu.dot_dimension_numbers<[1], [0], [0], [1], [0, 0, 1, 1], [], []>} : vector<16x96xf32>, vector<96x2xf32>, vector<16x2xf32> -> vector<16x2xf32>
    %c0_12 = arith.constant 0 : index
    %c0_13 = arith.constant 0 : index
    %15 = vector.load %arg5[%c0_12, %c0_13] : memref<16x1xbf16, #tpu.memory_space<vmem>>, vector<16x1xbf16>
    %16 = arith.extf %15 : vector<16x1xbf16> to vector<16x1xf32>
    %17 = vector.broadcast %16 : vector<16x1xf32> to vector<16x2xf32>
    %18 = arith.addf %14, %17 : vector<16x2xf32>
    %19 = arith.truncf %18 : vector<16x2xf32> to vector<16x2xbf16>
    %c0_14 = arith.constant 0 : index
    %c0_15 = arith.constant 0 : index
    %20 = vector.load %arg6[%c0_14, %c0_15] : memref<16x2xbf16, #tpu.memory_space<vmem>>, vector<16x2xbf16>
    tpu.vector_store %arg6[%c0_14, %c0_15], %19 {strides = array<i32>} : memref<16x2xbf16, #tpu.memory_space<vmem>>, vector<16x2xbf16>,
    return
  }
}

</mosaic_0001>

<bundles_post_ra>
// kernel: predictor_forward.1
= control target key start
LH: loop header
LB: loop body
LE: loop exit
PB: predicated region body
PF: predicated region fallthrough
CT: control target
= control target key end

     0   :  { %vm152_vm0 = vcmask 1043456   ;;  %vm1265_vm1 = vmmov 1   ;;  %v1266_v3 = vmov 0.0   ;;  %v1267_v8 = vmov 0   ;;  %s1669_s0 = inlined_call_operand.vmem [shape: f32[12,512], index: 0, kind: input, shape index: {}]   ;;  %s1670_s1 = inlined_call_operand.vmem [shape: f32[96,12], index: 1, kind: input, shape index: {}]   ;;  %s1671_s2 = inlined_call_operand.vmem [shape: f32[96,1], index: 2, kind: input, shape index: {}]   ;;  %s1672_s3 = inlined_call_operand.vmem [shape: f32[512,2], index: 3, kind: input, shape index: {}]   ;;  %s1673_s5 = inlined_call_operand.vmem [shape: bf16[16,1], index: 5, kind: input, shape index: {}]   ;;  %s1674_s4 = inlined_call_operand.vmem [shape: bf16[16,96], index: 4, kind: input, shape index: {}]   ;;  %s1675_s6 = inlined_call_operand.vmem [shape: bf16[16,2], index: 6, kind: output, shape index: {}]  }
   0x1   :  { %v36_v0 = vld [vmem:[%s1669_s0 + $0x8] sm:$0xff]  ;;  %vm1309_vm2 = vmpackc.low %vm152_vm0, %vm1265_vm1  ;;  %229 = vmatprep.mubr.f32.mxu0 %v1266_v3  ;;  %366 = vmatprep.mubr.f32.mxu1 %v1266_v3  ;;  %v38_v5 = vld [vmem:[%s1669_s0 + $0x18] sm:$0xff]  ;;  %vm115_vm3 = vcmask 97280   ;;  %vm837_vm4 = vcmask 785408   ;;  %vm927_vm5 = vcmask 11264  }
   0x2   :  { %v40_v1 = vld [vmem:[%s1669_s0 + $0x28] sm:$0xf]  ;;  %v42_v6 = vld [vmem:[%s1669_s0 + $0x38] sm:$0xf]  ;;  %v35_v7 = vld [vmem:[%s1669_s0] sm:$0xff]  ;;  %1256 = vset.pattern.permute.xlu0 %v1267_v8  ;;  %1257 = vset.pattern.permute.xlu1 %v1267_v8 }
   0x3   :  { %v1153_v4 = vpack.c.bf16 %v40_v1, %v36_v0  ;;  %v1159_v9 = vpack.c.bf16 %v42_v6, %v38_v5  ;;  %v39_v10 = vld [vmem:[%s1669_s0 + $0x20] sm:$0xf]  ;;  %v37_v11 = vld [vmem:[%s1669_s0 + $0x10] sm:$0xff]  ;;  %v24_v18 = vld [vmem:[%s1670_s1 + $0x8] sm:$0xff] }
   0x4   :  { %v41_v12 = vld [vmem:[%s1669_s0 + $0x30] sm:$0xf]  ;;  %v1156_v13 = vpack.c.bf16 %v39_v10, %v35_v7  ;;  %v23_v15 = vld [vmem:[%s1670_s1] sm:$0xff]  ;;  %v44_v19 = vld [vmem:[%s1671_s2 + $0x8] sm:$0xff] }
   0x5   :  { %1155 = vmatprep.subr.msk.bf16.mxu0 %vm1309_vm2, %v1153_v4  ;;  %v1162_v14 = vpack.c.bf16 %v41_v12, %v37_v11  ;;  %1161 = vmatprep.subr.msk.bf16.mxu1 %vm1309_vm2, %v1159_v9  ;;  %v43_v16 = vld [vmem:[%s1671_s2] sm:$0xff]  ;;  %v45_v17 = vld [vmem:[%s1671_s2 + $0x10] sm:$0xff]  ;;  %v46_v21 = vld [vmem:[%s1671_s2 + $0x18] sm:$0xff] }
   0x6   :  { %1158 = vmatpush1.bf16.msk.msra.mxu0 %vm1309_vm2, %v1156_v13  ;;  %57 = vperm.xlu0 %1256, %v43_v16   ;;  %v25_v20 = vld [vmem:[%s1670_s1 + $0x10] sm:$0xff]  ;;  %v503_v22 = vld [vmem:[%s1672_s3 + $0x80] sm:$0xff]  ;;  %v504_v23 = vld [vmem:[%s1672_s3 + $0x88] sm:$0xff] }
   0x7   :  { %1164 = vmatpush1.bf16.msk.msra.mxu1 %vm1309_vm2, %v1162_v14  ;;  %67 = vperm.xlu1 %1257, %v45_v17   ;;  %v1165_v24 = vpack.c.bf16 %v504_v23, %v503_v22  ;;  %v535_v25 = vld [vmem:[%s1672_s3 + $0x180] sm:$0xff]  ;;  %v536_v26 = vld [vmem:[%s1672_s3 + $0x188] sm:$0xff]  ;;  %v505_v36 = vld [vmem:[%s1672_s3 + $0x90] sm:$0xff] }
   0x8   :  { %v487_v27 = vld [vmem:[%s1672_s3] sm:$0xff]  ;;  %v1197_v28 = vpack.c.bf16 %v536_v26, %v535_v25  ;;  %v488_v29 = vld [vmem:[%s1672_s3 + $0x8] sm:$0xff]  ;;  %v506_v37 = vld [vmem:[%s1672_s3 + $0x98] sm:$0xff] }
   0x9   :  { %936 = vmatmul.mubr.msk.f32.vlgmr.msra.gmra.mrb[0].mxu0 %vm115_vm3, %v23_v15  ;;  %v519_v30 = vld [vmem:[%s1672_s3 + $0x100] sm:$0xff]  ;;  %v520_v31 = vld [vmem:[%s1672_s3 + $0x108] sm:$0xff]  ;;  %1166 = vmatprep.subr.bf16.mxu0 %v1165_v24  ;;  %v1167_v34 = vpack.c.bf16 %v488_v29, %v487_v27  ;;  %v537_v38 = vld [vmem:[%s1672_s3 + $0x190] sm:$0xff]  ;;  %v1169_v43 = vpack.c.bf16 %v506_v37, %v505_v36 }
   0xa   :  { %950 = vmatmul.mubr.msk.f32.vlgmr.msra.gmra.mrb[0].mxu1 %vm115_vm3, %v23_v15  ;;  %235 = vmatprep.mubr.f32.mxu0 %v1266_v3  ;;  %v47_v32 = vld [vmem:[%s1671_s2 + $0x20] sm:$0xff]  ;;  %v48_v33 = vld [vmem:[%s1671_s2 + $0x28] sm:$0xff]  ;;  %v1199_v35 = vpack.c.bf16 %v520_v31, %v519_v30  ;;  %v538_v39 = vld [vmem:[%s1672_s3 + $0x198] sm:$0xff] }
   0xb   :  { %372 = vmatprep.mubr.f32.mxu1 %v1266_v3  ;;  %62 = vperm.xlu0 %1256, %v44_v19   ;;  %v26_v40 = vld [vmem:[%s1670_s1 + $0x18] sm:$0xff]  ;;  %v49_v41 = vld [vmem:[%s1671_s2 + $0x30] sm:$0xff]  ;;  %v1201_v44 = vpack.c.bf16 %v538_v39, %v537_v38  ;;  %v27_v49 = vld [vmem:[%s1670_s1 + $0x20] sm:$0xff] }
   0xc   :  { %72 = vperm.xlu1 %1257, %v46_v21   ;;  %1198 = vmatprep.subr.bf16.mxu1 %v1197_v28  ;;  %v50_v42 = vld [vmem:[%s1671_s2 + $0x38] sm:$0xff]  ;;  %v489_v45 = vld [vmem:[%s1672_s3 + $0x10] sm:$0xff]  ;;  %v51_v50 = vld [vmem:[%s1671_s2 + $0x40] sm:$0xff] }
   0xd   :  { %937 = vmatmul.mubr.msk.f32.gmra.mrb[2].mxu0 %vm115_vm3, %v24_v18  ;;  %1200 = vmatpush3.bf16.msra.mxu1 %v1199_v35  ;;  %v490_v46 = vld [vmem:[%s1672_s3 + $0x18] sm:$0xff]  ;;  %v521_v47 = vld [vmem:[%s1672_s3 + $0x110] sm:$0xff]  ;;  %v973_v51 = vld [vmem:[%s1673_s5] sm:$0xff]  }
   0xe   :  { %951 = vmatmul.mubr.msk.f32.gmra.mrb[2].mxu1 %vm115_vm3, %v24_v18  ;;  %241 = vmatprep.mubr.f32.mxu0 %v1266_v3  ;;  %v522_v48 = vld [vmem:[%s1672_s3 + $0x118] sm:$0xff]  ;;  %v52_v52 = vld [vmem:[%s1671_s2 + $0x48] sm:$0xff]  ;;  %v1171_v53 = vpack.c.bf16 %v490_v46, %v489_v45  ;;  %v507_v55 = vld [vmem:[%s1672_s3 + $0xa0] sm:$0xff]  ;;  %v974_v61 = vunpack.c.l.bf16 %v973_v51  ;;  %v975_v62 = vunpack.c.h.bf16 %v973_v51 }
   0xf   :  { %378 = vmatprep.mubr.f32.mxu1 %v1266_v3  ;;  %77 = vperm.xlu0 %1256, %v47_v32   ;;  %v1203_v54 = vpack.c.bf16 %v522_v48, %v521_v47  ;;  %v508_v56 = vld [vmem:[%s1672_s3 + $0xa8] sm:$0xff]  ;;  %v539_v57 = vld [vmem:[%s1672_s3 + $0x1a0] sm:$0xff]  ;;  %v53_v60 = vld [vmem:[%s1671_s2 + $0x50] sm:$0xff] }
  0x10   :  { %82 = vperm.xlu1 %1257, %v48_v33   ;;  %1168 = vmatpush3.bf16.msra.mxu0 %v1167_v34  ;;  %v540_v58 = vld [vmem:[%s1672_s3 + $0x1a8] sm:$0xff]  ;;  %v54_v63 = vld [vmem:[%s1671_s2 + $0x58] sm:$0xff]  ;;  %v1173_v0 = vpack.c.bf16 %v508_v56, %v507_v55  ;;  %v491_v2 = vld [vmem:[%s1672_s3 + $0x20] sm:$0xff]  ;;  %v1258_v10 = vpack.i.bf16 %v975_v62, %v974_v61 }
  0x11   :  { %938 = vmatmul.mubr.msk.f32.gmra.mrb[4].mxu0 %vm115_vm3, %v25_v20  ;;  %1170 = vmatprep.subr.bf16.mxu0 %v1169_v43  ;;  %v28_v59 = vld [vmem:[%s1670_s1 + $0x28] sm:$0xff]  ;;  %v1205_v1 = vpack.c.bf16 %v540_v58, %v539_v57  ;;  %v523_v5 = vld [vmem:[%s1672_s3 + $0x120] sm:$0xff]  ;;  %v509_v7 = vld [vmem:[%s1672_s3 + $0xb0] sm:$0xff] }
  0x12   :  { %952 = vmatmul.mubr.msk.f32.gmra.mrb[4].mxu1 %vm115_vm3, %v25_v20  ;;  %247 = vmatprep.mubr.f32.mxu0 %v1266_v3  ;;  %v492_v4 = vld [vmem:[%s1672_s3 + $0x28] sm:$0xff]  ;;  %v510_v8 = vld [vmem:[%s1672_s3 + $0xb8] sm:$0xff]  ;;  %v29_v9 = vld [vmem:[%s1670_s1 + $0x30] sm:$0xff] }
  0x13   :  { %384 = vmatprep.mubr.f32.mxu1 %v1266_v3  ;;  %87 = vperm.xlu0 %1256, %v49_v41   ;;  %v524_v6 = vld [vmem:[%s1672_s3 + $0x128] sm:$0xff]  ;;  %v1175_v11 = vpack.c.bf16 %v492_v4, %v491_v2  ;;  %v541_v12 = vld [vmem:[%s1672_s3 + $0x1b0] sm:$0xff]  ;;  %v542_v13 = vld [vmem:[%s1672_s3 + $0x1b8] sm:$0xff]  ;;  %v1177_v15 = vpack.c.bf16 %v510_v8, %v509_v7 }
  0x14   :  { %92 = vperm.xlu1 %1257, %v50_v42   ;;  %1202 = vmatprep.subr.bf16.mxu1 %v1201_v44  ;;  %v1207_v14 = vpack.c.bf16 %v524_v6, %v523_v5  ;;  %v493_v16 = vld [vmem:[%s1672_s3 + $0x30] sm:$0xff]  ;;  %v494_v17 = vld [vmem:[%s1672_s3 + $0x38] sm:$0xff]  ;;  %v511_v20 = vld [vmem:[%s1672_s3 + $0xc0] sm:$0xff]  ;;  %v1209_v23 = vpack.c.bf16 %v542_v13, %v541_v12 }
  0x15   :  { %939 = vmatmul.mubr.msk.f32.gmra.mrb[6].mxu0 %vm115_vm3, %v26_v40  ;;  %1204 = vmatpush3.bf16.msra.mxu1 %v1203_v54  ;;  %v525_v18 = vld [vmem:[%s1672_s3 + $0x130] sm:$0xff]  ;;  %v526_v19 = vld [vmem:[%s1672_s3 + $0x138] sm:$0xff]  ;;  %v512_v21 = vld [vmem:[%s1672_s3 + $0xc8] sm:$0xff]  ;;  %v1179_v24 = vpack.c.bf16 %v494_v17, %v493_v16 }
  0x16   :  { %953 = vmatmul.mubr.msk.f32.gmra.mrb[6].mxu1 %vm115_vm3, %v26_v40  ;;  %253 = vmatprep.mubr.f32.mxu0 %v1266_v3  ;;  %v30_v22 = vld [vmem:[%s1670_s1 + $0x38] sm:$0xff]  ;;  %v543_v25 = vld [vmem:[%s1672_s3 + $0x1c0] sm:$0xff]  ;;  %v544_v26 = vld [vmem:[%s1672_s3 + $0x1c8] sm:$0xff]  ;;  %v1211_v27 = vpack.c.bf16 %v526_v19, %v525_v18  ;;  %v1181_v28 = vpack.c.bf16 %v512_v21, %v511_v20 }
  0x17   :  { %390 = vmatprep.mubr.f32.mxu1 %v1266_v3  ;;  %97 = vperm.xlu0 %1256, %v51_v50   ;;  %v495_v29 = vld [vmem:[%s1672_s3 + $0x40] sm:$0xff]  ;;  %v496_v30 = vld [vmem:[%s1672_s3 + $0x48] sm:$0xff]  ;;  %v513_v33 = vld [vmem:[%s1672_s3 + $0xd0] sm:$0xff]  ;;  %v1213_v36 = vpack.c.bf16 %v544_v26, %v543_v25 }
  0x18   :  { %102 = vperm.xlu1 %1257, %v52_v52   ;;  %1172 = vmatpush3.bf16.msra.mxu0 %v1171_v53  ;;  %v527_v31 = vld [vmem:[%s1672_s3 + $0x140] sm:$0xff]  ;;  %v528_v32 = vld [vmem:[%s1672_s3 + $0x148] sm:$0xff]  ;;  %v514_v34 = vld [vmem:[%s1672_s3 + $0xd8] sm:$0xff]  ;;  %v1183_v37 = vpack.c.bf16 %v496_v30, %v495_v29 }
  0x19   :  { %940 = vmatmul.mubr.msk.f32.gmra.mrb[8].mxu0 %vm115_vm3, %v27_v49  ;;  %1174 = vmatprep.subr.bf16.mxu0 %v1173_v0  ;;  %v31_v35 = vld [vmem:[%s1670_s1 + $0x40] sm:$0xff]  ;;  %v545_v38 = vld [vmem:[%s1672_s3 + $0x1d0] sm:$0xff]  ;;  %v546_v39 = vld [vmem:[%s1672_s3 + $0x1d8] sm:$0xff]  ;;  %v1215_v40 = vpack.c.bf16 %v528_v32, %v527_v31  ;;  %v1185_v41 = vpack.c.bf16 %v514_v34, %v513_v33 }
  0x1a   :  { %954 = vmatmul.mubr.msk.f32.gmra.mrb[8].mxu1 %vm115_vm3, %v27_v49  ;;  %259 = vmatprep.mubr.f32.mxu0 %v1266_v3  ;;  %v497_v42 = vld [vmem:[%s1672_s3 + $0x50] sm:$0xff]  ;;  %v498_v43 = vld [vmem:[%s1672_s3 + $0x58] sm:$0xff]  ;;  %v515_v46 = vld [vmem:[%s1672_s3 + $0xe0] sm:$0xff]  ;;  %v1217_v49 = vpack.c.bf16 %v546_v39, %v545_v38 }
  0x1b   :  { %396 = vmatprep.mubr.f32.mxu1 %v1266_v3  ;;  %107 = vperm.xlu0 %1256, %v53_v60   ;;  %v529_v44 = vld [vmem:[%s1672_s3 + $0x150] sm:$0xff]  ;;  %v530_v45 = vld [vmem:[%s1672_s3 + $0x158] sm:$0xff]  ;;  %v516_v47 = vld [vmem:[%s1672_s3 + $0xe8] sm:$0xff]  ;;  %v1187_v50 = vpack.c.bf16 %v498_v43, %v497_v42 }
  0x1c   :  { %112 = vperm.xlu1 %1257, %v54_v63   ;;  %1206 = vmatprep.subr.bf16.mxu1 %v1205_v1  ;;  %v32_v48 = vld [vmem:[%s1670_s1 + $0x48] sm:$0xff]  ;;  %v1219_v51 = vpack.c.bf16 %v530_v45, %v529_v44  ;;  %v1189_v52 = vpack.c.bf16 %v516_v47, %v515_v46  ;;  %v547_v53 = vld [vmem:[%s1672_s3 + $0x1e0] sm:$0xff]  ;;  %v33_v55 = vld [vmem:[%s1670_s1 + $0x50] sm:$0xff] }
  0x1d   :  { %941 = vmatmul.mubr.msk.f32.gmra.mrb[10].mxu0 %vm115_vm3, %v28_v59  ;;  %1208 = vmatpush3.bf16.msra.mxu1 %v1207_v14  ;;  %v548_v54 = vld [vmem:[%s1672_s3 + $0x1e8] sm:$0xff]  ;;  %v34_v57 = vld [vmem:[%s1670_s1 + $0x58] sm:$0xff]  ;;  %v499_v58 = vld [vmem:[%s1672_s3 + $0x60] sm:$0xff] }
  0x1e   :  { %955 = vmatmul.mubr.msk.f32.gmra.mrb[10].mxu1 %vm115_vm3, %v28_v59  ;;  %265 = vmatprep.mubr.f32.mxu0 %v1266_v3  ;;  %v1221_v56 = vpack.c.bf16 %v548_v54, %v547_v53  ;;  %v500_v59 = vld [vmem:[%s1672_s3 + $0x68] sm:$0xff]  ;;  %v517_v63 = vld [vmem:[%s1672_s3 + $0xf0] sm:$0xff]  ;;  %v518_v0 = vld [vmem:[%s1672_s3 + $0xf8] sm:$0xff] }
  0x1f   :  { %402 = vmatprep.mubr.f32.mxu1 %v1266_v3  ;;  %1259 = vperm.xlu0 %1256, %v1258_v10   ;;  %v1191_v60 = vpack.c.bf16 %v500_v59, %v499_v58  ;;  %v532_v61 = vld [vmem:[%s1672_s3 + $0x168] sm:$0xff]  ;;  %v549_v1 = vld [vmem:[%s1672_s3 + $0x1f0] sm:$0xff]  ;;  %v1193_v2 = vpack.c.bf16 %v518_v0, %v517_v63  ;;  %v550_v4 = vld [vmem:[%s1672_s3 + $0x1f8] sm:$0xff] }
  0x20   :  { %1176 = vmatpush3.bf16.msra.mxu0 %v1175_v11  ;;  %1210 = vmatprep.subr.bf16.mxu1 %v1209_v23  ;;  %v501_v5 = vld [vmem:[%s1672_s3 + $0x70] sm:$0xff]  ;;  %v502_v6 = vld [vmem:[%s1672_s3 + $0x78] sm:$0xff]  ;;  %v1225_v7 = vpack.c.bf16 %v550_v4, %v549_v1 }
  0x21   :  { %942 = vmatmul.mubr.msk.f32.gmra.mrb[12].mxu0 %vm115_vm3, %v29_v9  ;;  %1178 = vmatprep.subr.bf16.mxu0 %v1177_v15  ;;  %v1195_v8 = vpack.c.bf16 %v502_v6, %v501_v5  ;;  %v534_v10 = vld [vmem:[%s1672_s3 + $0x178] sm:$0xff] }
  0x22   :  { %956 = vmatmul.mubr.msk.f32.gmra.mrb[12].mxu1 %vm115_vm3, %v29_v9  ;;  %271 = vmatprep.mubr.f32.mxu0 %v1266_v3  ;;  %v533_v9 = vld [vmem:[%s1672_s3 + $0x170] sm:$0xff] }
  0x23   :  { %408 = vmatprep.mubr.f32.mxu1 %v1266_v3  ;;  %1212 = vmatpush3.bf16.msra.mxu1 %v1211_v27  ;;  %v1227_v11 = vpack.c.bf16 %v534_v10, %v533_v9 }
  0x24   :  { %1180 = vmatpush3.bf16.msra.mxu0 %v1179_v24  ;;  %1214 = vmatprep.subr.bf16.mxu1 %v1213_v36 }
  0x25   :  { %943 = vmatmul.mubr.msk.f32.gmra.mrb[14].mxu0 %vm115_vm3, %v30_v22  ;;  %1182 = vmatprep.subr.bf16.mxu0 %v1181_v28 }
  0x26   :  { %957 = vmatmul.mubr.msk.f32.gmra.mrb[14].mxu1 %vm115_vm3, %v30_v22  ;;  %277 = vmatprep.mubr.f32.mxu0 %v1266_v3 }
  0x27   :  { %414 = vmatprep.mubr.f32.mxu1 %v1266_v3  ;;  %1216 = vmatpush3.bf16.msra.mxu1 %v1215_v40 }
  0x28   :  { %1184 = vmatpush3.bf16.msra.mxu0 %v1183_v37  ;;  %1218 = vmatprep.subr.bf16.mxu1 %v1217_v49 }
  0x29   :  { %944 = vmatmul.mubr.msk.f32.gmra.mrb[16].mxu0 %vm115_vm3, %v31_v35  ;;  %1186 = vmatprep.subr.bf16.mxu0 %v1185_v41 }
  0x2a   :  { %958 = vmatmul.mubr.msk.f32.gmra.mrb[16].mxu1 %vm115_vm3, %v31_v35  ;;  %283 = vmatprep.mubr.f32.mxu0 %v1266_v3 }
  0x2b   :  { %420 = vmatprep.mubr.f32.mxu1 %v1266_v3  ;;  %1220 = vmatpush3.bf16.msra.mxu1 %v1219_v51 }
  0x2c   :  { %1188 = vmatpush3.bf16.msra.mxu0 %v1187_v50  ;;  %1222 = vmatprep.subr.bf16.mxu1 %v1221_v56 }
  0x2d   :  { %945 = vmatmul.mubr.msk.f32.gmra.mrb[18].mxu0 %vm115_vm3, %v32_v48  ;;  %1190 = vmatprep.subr.bf16.mxu0 %v1189_v52 }
  0x2e   :  { %959 = vmatmul.mubr.msk.f32.gmra.mrb[18].mxu1 %vm115_vm3, %v32_v48  ;;  %289 = vmatprep.mubr.f32.mxu0 %v1266_v3 }
  0x2f   :  { %426 = vmatprep.mubr.f32.mxu1 %v1266_v3 }
  0x30   :  { %1192 = vmatpush3.bf16.msra.mxu0 %v1191_v60 }
  0x31   :  { %946 = vmatmul.mubr.msk.f32.gmra.mrb[20].mxu0 %vm115_vm3, %v33_v55  ;;  %1194 = vmatprep.subr.bf16.mxu0 %v1193_v2 }
  0x32   :  { %960 = vmatmul.mubr.msk.f32.gmra.mrb[20].mxu1 %vm115_vm3, %v33_v55  ;;  %295 = vmatprep.mubr.f32.mxu0 %v1266_v3 }
  0x33   :  { %432 = vmatprep.mubr.f32.mxu1 %v1266_v3  ;;  %v531_v3 = vld [vmem:[%s1672_s3 + $0x160] sm:$0xff] }
  0x34   :  { %v1223_v62 = vpack.c.bf16 %v532_v61, %v531_v3  ;;  %1196 = vmatpush3.bf16.msra.mxu0 %v1195_v8 }
  0x35   :  { %947 = vmatmul.mubr.msk.f32.gmra.mrb[22].mxu0 %vm115_vm3, %v34_v57 }
  0x36   :  { %961 = vmatmul.mubr.msk.f32.gmra.mrb[22].mxu1 %vm115_vm3, %v34_v57 }
  0x37   :  { %1224 = vmatpush3.bf16.msra.mxu1 %v1223_v62 }
  0x38   :  { %1226 = vmatprep.subr.bf16.mxu1 %v1225_v7 }
  0x3b   :  { %1228 = vmatpush3.bf16.msra.mxu1 %v1227_v11 }
  0x85   :  { %v58_v12 = vpop.permute.xlu0 %57 }
  0x86   :  { %v68_v22 = vpop.permute.xlu1 %67 }
  0x8a   :  { %v63_v21 = vpop.permute.xlu0 %62 }
  0x8b   :  { %v73_v47 = vpop.permute.xlu1 %72 }
  0x8e   :  { %v78_v3 = vpop.permute.xlu0 %77 }
  0x8f   :  { %v83_v9 = vpop.permute.xlu1 %82 }
  0xdc   :  { %v231_v13 = vpop.f32.mrb[0].mxu0 }
  0xdd   :  { %v368_v14 = vpop.f32.mrb[0].mxu1  ;;  %v232_v15 = vadd.f32 %v231_v13, %v58_v12  ;;  %v233_v17 = vpop.f32.mrb[1].mxu0 }
  0xde   :  { %v369_v16 = vadd.f32 %v368_v14, %v58_v12  ;;  %v370_v18 = vpop.f32.mrb[1].mxu1  ;;  %v234_v19 = vadd.f32 %v233_v17, %v58_v12 }
  0xdf   :  { %v371_v20 = vadd.f32 %v370_v18, %v58_v12  ;;  %v439_v27 = vmax.f32 %v232_v15, 0.0 }
  0xe0   :  { %v440_v23 = vmax.f32 %v234_v19, 0.0  ;;  %v237_v25 = vpop.f32.mrb[2].mxu0  ;;  %v441_v28 = vmax.f32 %v369_v16, 0.0 }
  0xe1   :  { %v442_v24 = vmax.f32 %v371_v20, 0.0  ;;  %v374_v26 = vpop.f32.mrb[2].mxu1  ;;  %v238_v29 = vadd.f32 %v237_v25, %v63_v21  ;;  %v239_v31 = vpop.f32.mrb[3].mxu0 }
  0xe2   :  { %v375_v30 = vadd.f32 %v374_v26, %v63_v21  ;;  %v376_v32 = vpop.f32.mrb[3].mxu1  ;;  %v240_v33 = vadd.f32 %v239_v31, %v63_v21  ;;  %615 = vmatprep.mubr.f32.mxu0 %v440_v23 }
  0xe3   :  { %v377_v34 = vadd.f32 %v376_v32, %v63_v21  ;;  %740 = vmatprep.mubr.f32.mxu1 %v442_v24  ;;  %616 = vmatmul.mubr.f32.vlgmr.msra.gmra.mrb[24].mxu0 %v439_v27  ;;  %v443_v39 = vmax.f32 %v238_v29, 0.0 }
  0xe4   :  { %741 = vmatmul.mubr.f32.vlgmr.msra.gmra.mrb[24].mxu1 %v441_v28  ;;  %v444_v35 = vmax.f32 %v240_v33, 0.0  ;;  %v243_v37 = vpop.f32.mrb[4].mxu0  ;;  %v445_v40 = vmax.f32 %v375_v30, 0.0 }
  0xe5   :  { %v446_v36 = vmax.f32 %v377_v34, 0.0  ;;  %v380_v38 = vpop.f32.mrb[4].mxu1  ;;  %v244_v41 = vadd.f32 %v243_v37, %v68_v22  ;;  %v245_v43 = vpop.f32.mrb[5].mxu0 }
  0xe6   :  { %v381_v42 = vadd.f32 %v380_v38, %v68_v22  ;;  %v382_v44 = vpop.f32.mrb[5].mxu1  ;;  %v246_v45 = vadd.f32 %v245_v43, %v68_v22  ;;  %620 = vmatprep.mubr.f32.mxu0 %v444_v35  ;;  %v93_v35 = vpop.permute.xlu1 %92 }
  0xe7   :  { %v383_v46 = vadd.f32 %v382_v44, %v68_v22  ;;  %745 = vmatprep.mubr.f32.mxu1 %v446_v36  ;;  %621 = vmatmul.mubr.f32.gmra.mrb[26].mxu0 %v443_v39  ;;  %v447_v52 = vmax.f32 %v244_v41, 0.0  ;;  %v88_v22 = vpop.permute.xlu0 %87 }
  0xe8   :  { %746 = vmatmul.mubr.f32.gmra.mrb[26].mxu1 %v445_v40  ;;  %v448_v48 = vmax.f32 %v246_v45, 0.0  ;;  %v249_v50 = vpop.f32.mrb[6].mxu0  ;;  %v449_v53 = vmax.f32 %v381_v42, 0.0 }
  0xe9   :  { %v450_v49 = vmax.f32 %v383_v46, 0.0  ;;  %v386_v51 = vpop.f32.mrb[6].mxu1  ;;  %v250_v54 = vadd.f32 %v249_v50, %v73_v47  ;;  %v251_v56 = vpop.f32.mrb[7].mxu0 }
  0xea   :  { %v387_v55 = vadd.f32 %v386_v51, %v73_v47  ;;  %v388_v57 = vpop.f32.mrb[7].mxu1  ;;  %v252_v58 = vadd.f32 %v251_v56, %v73_v47  ;;  %625 = vmatprep.mubr.f32.mxu0 %v448_v48 }
  0xeb   :  { %v389_v59 = vadd.f32 %v388_v57, %v73_v47  ;;  %750 = vmatprep.mubr.f32.mxu1 %v450_v49  ;;  %626 = vmatmul.mubr.f32.gmra.mrb[28].mxu0 %v447_v52  ;;  %v451_v0 = vmax.f32 %v250_v54, 0.0  ;;  %v98_v48 = vpop.permute.xlu0 %97 }
  0xec   :  { %751 = vmatmul.mubr.f32.gmra.mrb[28].mxu1 %v449_v53  ;;  %v452_v60 = vmax.f32 %v252_v58, 0.0  ;;  %v255_v62 = vpop.f32.mrb[8].mxu0  ;;  %v453_v1 = vmax.f32 %v387_v55, 0.0 }
  0xed   :  { %v454_v61 = vmax.f32 %v389_v59, 0.0  ;;  %v392_v63 = vpop.f32.mrb[8].mxu1  ;;  %v256_v2 = vadd.f32 %v255_v62, %v78_v3  ;;  %v257_v5 = vpop.f32.mrb[9].mxu0 }
  0xee   :  { %v393_v4 = vadd.f32 %v392_v63, %v78_v3  ;;  %v394_v6 = vpop.f32.mrb[9].mxu1  ;;  %v258_v7 = vadd.f32 %v257_v5, %v78_v3  ;;  %630 = vmatprep.mubr.f32.mxu0 %v452_v60  ;;  %v103_v60 = vpop.permute.xlu1 %102 }
  0xef   :  { %v395_v8 = vadd.f32 %v394_v6, %v78_v3  ;;  %755 = vmatprep.mubr.f32.mxu1 %v454_v61  ;;  %631 = vmatmul.mubr.f32.gmra.mrb[30].mxu0 %v451_v0  ;;  %v455_v14 = vmax.f32 %v256_v2, 0.0 }
  0xf0   :  { %756 = vmatmul.mubr.f32.gmra.mrb[30].mxu1 %v453_v1  ;;  %v456_v10 = vmax.f32 %v258_v7, 0.0  ;;  %v261_v12 = vpop.f32.mrb[10].mxu0  ;;  %v457_v15 = vmax.f32 %v393_v4, 0.0 }
  0xf1   :  { %v458_v11 = vmax.f32 %v395_v8, 0.0  ;;  %v398_v13 = vpop.f32.mrb[10].mxu1  ;;  %v262_v16 = vadd.f32 %v261_v12, %v83_v9  ;;  %v263_v18 = vpop.f32.mrb[11].mxu0 }
  0xf2   :  { %v399_v17 = vadd.f32 %v398_v13, %v83_v9  ;;  %v400_v19 = vpop.f32.mrb[11].mxu1  ;;  %v264_v20 = vadd.f32 %v263_v18, %v83_v9  ;;  %635 = vmatprep.mubr.f32.mxu0 %v456_v10  ;;  %v108_v10 = vpop.permute.xlu0 %107 }
  0xf3   :  { %v401_v21 = vadd.f32 %v400_v19, %v83_v9  ;;  %760 = vmatprep.mubr.f32.mxu1 %v458_v11  ;;  %636 = vmatmul.mubr.f32.gmra.mrb[32].mxu0 %v455_v14  ;;  %v459_v27 = vmax.f32 %v262_v16, 0.0 }
  0xf4   :  { %761 = vmatmul.mubr.f32.gmra.mrb[32].mxu1 %v457_v15  ;;  %v460_v23 = vmax.f32 %v264_v20, 0.0  ;;  %v267_v25 = vpop.f32.mrb[12].mxu0  ;;  %v461_v28 = vmax.f32 %v399_v17, 0.0 }
  0xf5   :  { %v462_v24 = vmax.f32 %v401_v21, 0.0  ;;  %v404_v26 = vpop.f32.mrb[12].mxu1  ;;  %v268_v29 = vadd.f32 %v267_v25, %v88_v22  ;;  %v269_v31 = vpop.f32.mrb[13].mxu0 }
  0xf6   :  { %v405_v30 = vadd.f32 %v404_v26, %v88_v22  ;;  %v406_v32 = vpop.f32.mrb[13].mxu1  ;;  %v270_v33 = vadd.f32 %v269_v31, %v88_v22  ;;  %640 = vmatprep.mubr.f32.mxu0 %v460_v23  ;;  %v113_v23 = vpop.permute.xlu1 %112 }
  0xf7   :  { %v407_v34 = vadd.f32 %v406_v32, %v88_v22  ;;  %765 = vmatprep.mubr.f32.mxu1 %v462_v24  ;;  %641 = vmatmul.mubr.f32.gmra.mrb[34].mxu0 %v459_v27  ;;  %v463_v40 = vmax.f32 %v268_v29, 0.0 }
  0xf8   :  { %766 = vmatmul.mubr.f32.gmra.mrb[34].mxu1 %v461_v28  ;;  %v464_v36 = vmax.f32 %v270_v33, 0.0  ;;  %v273_v38 = vpop.f32.mrb[14].mxu0  ;;  %v465_v41 = vmax.f32 %v405_v30, 0.0 }
  0xf9   :  { %v466_v37 = vmax.f32 %v407_v34, 0.0  ;;  %v410_v39 = vpop.f32.mrb[14].mxu1  ;;  %v274_v42 = vadd.f32 %v273_v38, %v93_v35  ;;  %v275_v44 = vpop.f32.mrb[15].mxu0 }
  0xfa   :  { %v411_v43 = vadd.f32 %v410_v39, %v93_v35  ;;  %v412_v45 = vpop.f32.mrb[15].mxu1  ;;  %v276_v46 = vadd.f32 %v275_v44, %v93_v35  ;;  %645 = vmatprep.mubr.f32.mxu0 %v464_v36 }
  0xfb   :  { %v413_v47 = vadd.f32 %v412_v45, %v93_v35  ;;  %770 = vmatprep.mubr.f32.mxu1 %v466_v37  ;;  %646 = vmatmul.mubr.f32.gmra.mrb[36].mxu0 %v463_v40  ;;  %v467_v53 = vmax.f32 %v274_v42, 0.0  ;;  %v1657_v40 = vld [vmem:[%s1674_s4] sm:$0xff]  }
  0xfc   :  { %771 = vmatmul.mubr.f32.gmra.mrb[36].mxu1 %v465_v41  ;;  %v468_v49 = vmax.f32 %v276_v46, 0.0  ;;  %v279_v51 = vpop.f32.mrb[16].mxu0  ;;  %v469_v54 = vmax.f32 %v411_v43, 0.0  ;;  %v970_v41 = vunpack.c.l.bf16 %v1657_v40 }
  0xfd   :  { %v470_v50 = vmax.f32 %v413_v47, 0.0  ;;  %v416_v52 = vpop.f32.mrb[16].mxu1  ;;  %v280_v55 = vadd.f32 %v279_v51, %v98_v48  ;;  %v281_v57 = vpop.f32.mrb[17].mxu0 }
  0xfe   :  { %v417_v56 = vadd.f32 %v416_v52, %v98_v48  ;;  %v418_v58 = vpop.f32.mrb[17].mxu1  ;;  %v282_v59 = vadd.f32 %v281_v57, %v98_v48  ;;  %650 = vmatprep.mubr.f32.mxu0 %v468_v49 }
  0xff   :  { %v419_v3 = vadd.f32 %v418_v58, %v98_v48  ;;  %775 = vmatprep.mubr.f32.mxu1 %v470_v50  ;;  %651 = vmatmul.mubr.f32.gmra.mrb[38].mxu0 %v467_v53  ;;  %v471_v1 = vmax.f32 %v280_v55, 0.0 }
 0x100   :  { %776 = vmatmul.mubr.f32.gmra.mrb[38].mxu1 %v469_v54  ;;  %v472_v61 = vmax.f32 %v282_v59, 0.0  ;;  %v285_v63 = vpop.f32.mrb[18].mxu0  ;;  %v473_v2 = vmax.f32 %v417_v56, 0.0 }
 0x101   :  { %v474_v62 = vmax.f32 %v419_v3, 0.0  ;;  %v422_v0 = vpop.f32.mrb[18].mxu1  ;;  %v286_v4 = vadd.f32 %v285_v63, %v103_v60  ;;  %v287_v6 = vpop.f32.mrb[19].mxu0 }
 0x102   :  { %v423_v5 = vadd.f32 %v422_v0, %v103_v60  ;;  %v424_v7 = vpop.f32.mrb[19].mxu1  ;;  %v288_v8 = vadd.f32 %v287_v6, %v103_v60  ;;  %655 = vmatprep.mubr.f32.mxu0 %v472_v61 }
 0x103   :  { %v425_v9 = vadd.f32 %v424_v7, %v103_v60  ;;  %780 = vmatprep.mubr.f32.mxu1 %v474_v62  ;;  %656 = vmatmul.mubr.f32.gmra.mrb[40].mxu0 %v471_v1  ;;  %v475_v15 = vmax.f32 %v286_v4, 0.0 }
 0x104   :  { %781 = vmatmul.mubr.f32.gmra.mrb[40].mxu1 %v473_v2  ;;  %v476_v11 = vmax.f32 %v288_v8, 0.0  ;;  %v291_v13 = vpop.f32.mrb[20].mxu0  ;;  %v477_v16 = vmax.f32 %v423_v5, 0.0 }
 0x105   :  { %v478_v12 = vmax.f32 %v425_v9, 0.0  ;;  %v428_v14 = vpop.f32.mrb[20].mxu1  ;;  %v292_v17 = vadd.f32 %v291_v13, %v108_v10  ;;  %v293_v19 = vpop.f32.mrb[21].mxu0 }
 0x106   :  { %v429_v18 = vadd.f32 %v428_v14, %v108_v10  ;;  %v430_v20 = vpop.f32.mrb[21].mxu1  ;;  %v294_v21 = vadd.f32 %v293_v19, %v108_v10  ;;  %660 = vmatprep.mubr.f32.mxu0 %v476_v11 }
 0x107   :  { %v431_v22 = vadd.f32 %v430_v20, %v108_v10  ;;  %785 = vmatprep.mubr.f32.mxu1 %v478_v12  ;;  %661 = vmatmul.mubr.f32.gmra.mrb[42].mxu0 %v475_v15  ;;  %v479_v28 = vmax.f32 %v292_v17, 0.0 }
 0x108   :  { %786 = vmatmul.mubr.f32.gmra.mrb[42].mxu1 %v477_v16  ;;  %v480_v24 = vmax.f32 %v294_v21, 0.0  ;;  %v297_v26 = vpop.f32.mrb[22].mxu0  ;;  %v481_v29 = vmax.f32 %v429_v18, 0.0 }
 0x109   :  { %v482_v25 = vmax.f32 %v431_v22, 0.0  ;;  %v434_v27 = vpop.f32.mrb[22].mxu1  ;;  %v298_v30 = vadd.f32 %v297_v26, %v113_v23  ;;  %v299_v32 = vpop.f32.mrb[23].mxu0 }
 0x10a   :  { %v435_v31 = vadd.f32 %v434_v27, %v113_v23  ;;  %v436_v33 = vpop.f32.mrb[23].mxu1  ;;  %v300_v34 = vadd.f32 %v299_v32, %v113_v23  ;;  %665 = vmatprep.mubr.f32.mxu0 %v480_v24 }
 0x10b   :  { %v437_v35 = vadd.f32 %v436_v33, %v113_v23  ;;  %790 = vmatprep.mubr.f32.mxu1 %v482_v25  ;;  %666 = vmatmul.mubr.f32.gmra.mrb[44].mxu0 %v479_v28  ;;  %v483_v38 = vmax.f32 %v298_v30, 0.0 }
 0x10c   :  { %791 = vmatmul.mubr.f32.gmra.mrb[44].mxu1 %v481_v29  ;;  %v484_v36 = vmax.f32 %v300_v34, 0.0  ;;  %v485_v39 = vmax.f32 %v435_v31, 0.0 }
 0x10d   :  { %v486_v37 = vmax.f32 %v437_v35, 0.0 }
 0x10e   :  { %670 = vmatprep.mubr.f32.mxu0 %v484_v36 }
 0x10f   :  { %795 = vmatprep.mubr.f32.mxu1 %v486_v37  ;;  %671 = vmatmul.mubr.f32.gmra.mrb[46].mxu0 %v483_v38 }
 0x110   :  { %796 = vmatmul.mubr.f32.gmra.mrb[46].mxu1 %v485_v39  ;;  %1150 = vmatprep.mubr.msk.f32.mxu0 %vm837_vm4, %v970_v41 }
 0x1b6   :  { %v1008_v42 = vpop.f32.mrb[24].mxu0 }
 0x1b7   :  { %v1076_v43 = vpop.f32.mrb[24].mxu1  ;;  %v1009_v44 = vpop.f32.mrb[25].mxu0 }
 0x1b8   :  { %v1077_v45 = vpop.f32.mrb[25].mxu1  ;;  %v1010_v46 = vadd.f32 %v1009_v44, %v1008_v42 }
 0x1b9   :  { %v1078_v47 = vadd.f32 %v1077_v45, %v1076_v43 }
 0x1ba   :  { %v1011_v49 = vpop.f32.mrb[26].mxu0 }
 0x1bb   :  { %v743_v48 = vadd.f32 %v1078_v47, %v1010_v46  ;;  %v1079_v50 = vpop.f32.mrb[26].mxu1  ;;  %v1012_v51 = vpop.f32.mrb[27].mxu0 }
 0x1bc   :  { %v1080_v52 = vpop.f32.mrb[27].mxu1  ;;  %v1013_v53 = vadd.f32 %v1012_v51, %v1011_v49 }
 0x1bd   :  { %v1081_v54 = vadd.f32 %v1080_v52, %v1079_v50 }
 0x1be   :  { %v1014_v56 = vpop.f32.mrb[28].mxu0 }
 0x1bf   :  { %v748_v55 = vadd.f32 %v1081_v54, %v1013_v53  ;;  %v1082_v57 = vpop.f32.mrb[28].mxu1  ;;  %v1015_v58 = vpop.f32.mrb[29].mxu0 }
 0x1c0   :  { %v1083_v59 = vpop.f32.mrb[29].mxu1  ;;  %v1016_v3 = vadd.f32 %v1015_v58, %v1014_v56 }
 0x1c1   :  { %v1084_v60 = vadd.f32 %v1083_v59, %v1082_v57  ;;  %v801_v61 = vpack.c.bf16 %v748_v55, %v743_v48 }
 0x1c2   :  { %v1017_v63 = vpop.f32.mrb[30].mxu0 }
 0x1c3   :  { %v753_v62 = vadd.f32 %v1084_v60, %v1016_v3  ;;  %v1085_v0 = vpop.f32.mrb[30].mxu1  ;;  %1230 = vmatprep.subr.bf16.mxu0 %v801_v61  ;;  %v1018_v1 = vpop.f32.mrb[31].mxu0 }
 0x1c4   :  { %v1086_v2 = vpop.f32.mrb[31].mxu1  ;;  %1232 = vmatpush3.bf16.msra.mxu0 %v801_v61  ;;  %v1019_v4 = vadd.f32 %v1018_v1, %v1017_v63 }
 0x1c5   :  { %v1087_v5 = vadd.f32 %v1086_v2, %v1085_v0 }
 0x1c6   :  { %v1020_v7 = vpop.f32.mrb[32].mxu0 }
 0x1c7   :  { %v758_v6 = vadd.f32 %v1087_v5, %v1019_v4  ;;  %v1088_v8 = vpop.f32.mrb[32].mxu1  ;;  %v1021_v9 = vpop.f32.mrb[33].mxu0  ;;  %v971_v5 = vunpack.c.h.bf16 %v1657_v40 }
 0x1c8   :  { %v1089_v10 = vpop.f32.mrb[33].mxu1  ;;  %v1022_v11 = vadd.f32 %v1021_v9, %v1020_v7 }
 0x1c9   :  { %v1090_v12 = vadd.f32 %v1089_v10, %v1088_v8  ;;  %v802_v13 = vpack.c.bf16 %v758_v6, %v753_v62  ;;  %v1260_v6 = vpop.permute.xlu0 %1259 }
 0x1ca   :  { %v1023_v15 = vpop.f32.mrb[34].mxu0 }
 0x1cb   :  { %v763_v14 = vadd.f32 %v1090_v12, %v1022_v11  ;;  %v1091_v16 = vpop.f32.mrb[34].mxu1  ;;  %1234 = vmatprep.subr.bf16.mxu0 %v802_v13  ;;  %v1024_v17 = vpop.f32.mrb[35].mxu0 }
 0x1cc   :  { %v1092_v18 = vpop.f32.mrb[35].mxu1  ;;  %1236 = vmatpush3.bf16.msra.mxu0 %v802_v13  ;;  %v1025_v19 = vadd.f32 %v1024_v17, %v1023_v15 }
 0x1cd   :  { %v1093_v20 = vadd.f32 %v1092_v18, %v1091_v16 }
 0x1ce   :  { %v1026_v22 = vpop.f32.mrb[36].mxu0 }
 0x1cf   :  { %v768_v21 = vadd.f32 %v1093_v20, %v1025_v19  ;;  %v1094_v23 = vpop.f32.mrb[36].mxu1  ;;  %v1027_v24 = vpop.f32.mrb[37].mxu0 }
 0x1d0   :  { %v1095_v25 = vpop.f32.mrb[37].mxu1  ;;  %v1028_v26 = vadd.f32 %v1027_v24, %v1026_v22 }
 0x1d1   :  { %v1096_v27 = vadd.f32 %v1095_v25, %v1094_v23  ;;  %v803_v28 = vpack.c.bf16 %v768_v21, %v763_v14 }
 0x1d2   :  { %v1029_v30 = vpop.f32.mrb[38].mxu0 }
 0x1d3   :  { %v773_v29 = vadd.f32 %v1096_v27, %v1028_v26  ;;  %v1097_v31 = vpop.f32.mrb[38].mxu1  ;;  %1238 = vmatprep.subr.bf16.mxu0 %v803_v28  ;;  %v1030_v32 = vpop.f32.mrb[39].mxu0 }
 0x1d4   :  { %v1098_v33 = vpop.f32.mrb[39].mxu1  ;;  %1240 = vmatpush3.bf16.msra.mxu0 %v803_v28  ;;  %v1031_v34 = vadd.f32 %v1030_v32, %v1029_v30 }
 0x1d5   :  { %v1099_v35 = vadd.f32 %v1098_v33, %v1097_v31 }
 0x1d6   :  { %v1032_v37 = vpop.f32.mrb[40].mxu0 }
 0x1d7   :  { %v778_v36 = vadd.f32 %v1099_v35, %v1031_v34  ;;  %v1100_v38 = vpop.f32.mrb[40].mxu1  ;;  %v1033_v39 = vpop.f32.mrb[41].mxu0 }
 0x1d8   :  { %v1101_v41 = vpop.f32.mrb[41].mxu1  ;;  %v1034_v42 = vadd.f32 %v1033_v39, %v1032_v37 }
 0x1d9   :  { %v1102_v43 = vadd.f32 %v1101_v41, %v1100_v38  ;;  %v804_v44 = vpack.c.bf16 %v778_v36, %v773_v29 }
 0x1da   :  { %v1035_v46 = vpop.f32.mrb[42].mxu0 }
 0x1db   :  { %v783_v45 = vadd.f32 %v1102_v43, %v1034_v42  ;;  %v1103_v47 = vpop.f32.mrb[42].mxu1  ;;  %1242 = vmatprep.subr.bf16.mxu0 %v804_v44  ;;  %v1036_v48 = vpop.f32.mrb[43].mxu0 }
 0x1dc   :  { %v1104_v49 = vpop.f32.mrb[43].mxu1  ;;  %1244 = vmatpush3.bf16.msra.mxu0 %v804_v44  ;;  %v1037_v50 = vadd.f32 %v1036_v48, %v1035_v46 }
 0x1dd   :  { %v1105_v51 = vadd.f32 %v1104_v49, %v1103_v47 }
 0x1de   :  { %v1038_v53 = vpop.f32.mrb[44].mxu0 }
 0x1df   :  { %v788_v52 = vadd.f32 %v1105_v51, %v1037_v50  ;;  %v1106_v54 = vpop.f32.mrb[44].mxu1  ;;  %v1039_v55 = vpop.f32.mrb[45].mxu0 }
 0x1e0   :  { %v1107_v56 = vpop.f32.mrb[45].mxu1  ;;  %v1040_v57 = vadd.f32 %v1039_v55, %v1038_v53 }
 0x1e1   :  { %v1108_v58 = vadd.f32 %v1107_v56, %v1106_v54  ;;  %v805_v59 = vpack.c.bf16 %v788_v52, %v783_v45 }
 0x1e2   :  { %v1041_v60 = vpop.f32.mrb[46].mxu0 }
 0x1e3   :  { %v793_v3 = vadd.f32 %v1108_v58, %v1040_v57  ;;  %v1109_v61 = vpop.f32.mrb[46].mxu1  ;;  %1246 = vmatprep.subr.bf16.mxu0 %v805_v59  ;;  %v1042_v62 = vpop.f32.mrb[47].mxu0 }
 0x1e4   :  { %v1110_v63 = vpop.f32.mrb[47].mxu1  ;;  %1248 = vmatpush3.bf16.msra.mxu0 %v805_v59  ;;  %v1043_v0 = vadd.f32 %v1042_v62, %v1041_v60 }
 0x1e5   :  { %v1111_v1 = vadd.f32 %v1110_v63, %v1109_v61 }
 0x1e7   :  { %v798_v2 = vadd.f32 %v1111_v1, %v1043_v0 }
 0x1e9   :  { %v806_v4 = vpack.c.bf16 %v798_v2, %v793_v3 }
 0x1eb   :  { %1250 = vmatprep.subr.bf16.mxu0 %v806_v4 }
 0x1ec   :  { %1252 = vmatpush3.bf16.msra.mxu0 %v806_v4 }
 0x1ef   :  { %1151 = vmatmul.mubr.msk.f32.vlgmr.msra.gmra.mrb[48].mxu0 %vm837_vm4, %v971_v5 }
 0x2c2   :  { %v1152_v7 = vpop.f32.mrb[48].mxu0 }
 0x2c3   :  { %v1263_v8 = vadd.high.f32.bf16 %v1152_v7, %v1260_v6  ;;  %v910_v9 = vpop.f32.mrb[49].mxu0 }
 0x2c4   :  { %v1264_v10 = vadd.low.f32.bf16 %v910_v9, %v1260_v6 }
 0x2c5   :  { %v967_v11 = vpack.c.bf16 %v1263_v8, %v1263_v8 }
 0x2c6   :  { %v966_v12 = vpack.c.bf16 %v1264_v10, %v1264_v10 }
 0x2c7   :  { %929 = vst.msk [vmem:[%s1675_s6 + $0x4] sm:$0xf] %vm927_vm5, %v967_v11 }
 0x2c8   :  { %928 = vst.msk [vmem:[%s1675_s6] sm:$0xf] %vm927_vm5, %v966_v12 }

</bundles_post_ra>
